<compile_context>
chip_gen: v7x
topology: tpu7x:2x2x1
jax: 0.10.0
libtpu: 0.0.40
codegen_flags: <defaults>
</compile_context>

<pallas_src>
import functools

import jax
import jax.numpy as jnp
from jax import lax
from jax.experimental import pallas as pl
from jax.experimental.pallas import tpu as pltpu


def _weighted_loss_kernel(o_ref, t_ref, w_ref, acc_ref, *,
                          block_rows, steps, rows, needs_mask):
    """o/t: (block_rows, 128) tile; w: (1, 128); acc: (8, 128) resident f32."""
    c = pl.program_id(0)
    i = pl.program_id(1)

    @pl.when(i == 0)
    def _init():
        acc_ref[...] = jnp.zeros_like(acc_ref)

    # Pure VPU elementwise work; the kernel is HBM-bandwidth bound.
    v = jnp.abs(o_ref[...].astype(jnp.float32) - t_ref[...].astype(jnp.float32))
    v = v * w_ref[...]                                   # (1,128) lane broadcast

    if needs_mask:
        # Mask rows past the (static) end of the data; garbage in the padded
        # region of a partial / duplicated edge block is discarded by the
        # select.  Note: uses the UN-clamped block index, so grid block visits
        # that were clamped in the index_map contribute exactly zero.
        row0 = (c * steps + i) * block_rows
        ridx = row0 + lax.broadcasted_iota(jnp.int32, (block_rows, 128), 0)
        v = jnp.where(ridx < rows, v, 0.0)

    # Fold the (block_rows, 128) tile into the fixed (8, 128) accumulator.
    # The reshape splits the sublane-major axis at tile boundaries (block_rows
    # is a multiple of 8), so it is layout-preserving.
    acc_ref[...] += v.reshape(block_rows // 8, 8, 128).sum(axis=0)


def weighted_loss(outputs, targets, base_weights, *,
                  tile_bytes=2 << 20, n_split=1,
                  min_pallas_elems=1 << 18, force_pallas=False):
    """Returns sum(|outputs - targets| * base_weights[None, :]) as a scalar f32.

    outputs, targets: (B, P); base_weights: (P,).  Same math as the PyTorch
    WeightedLoss.forward (weights tiled over the batch).
    """
    outputs = jnp.asarray(outputs)
    targets = jnp.asarray(targets)
    base_weights = jnp.asarray(base_weights, jnp.float32)

    if outputs.dtype != targets.dtype:
        dt = jnp.promote_types(outputs.dtype, targets.dtype)
        outputs, targets = outputs.astype(dt), targets.astype(dt)
    if not jnp.issubdtype(outputs.dtype, jnp.floating):
        outputs, targets = outputs.astype(jnp.float32), targets.astype(jnp.float32)

    B, P = outputs.shape
    N = B * P

    lane_ok = (128 % P == 0) and (N % 128 == 0)
    big_enough = force_pallas or (N >= min_pallas_elems)
    if not (lane_ok and big_enough):
        # Tiny or unaligned problems: a single fused XLA elementwise+reduce is
        # already ~roofline and avoids any relayout / launch overhead.
        # TODO(synk): a flat 1-D Pallas layout could also cover B*P % 128 != 0
        # without extra HBM passes; not needed for the module's P=8 shapes.
        return jnp.sum(jnp.abs(outputs.astype(jnp.float32)
                               - targets.astype(jnp.float32))
                       * base_weights[None, :])

    # --- zero-copy lane-dense view ------------------------------------------
    # Element (r, l) of the (rows, 128) view is column (l % P) of the original
    # (B, P) array (128 % P == 0), so the per-column weights collapse to a
    # single (1, 128) lane row that is identical for every row.
    rows = N // 128
    o2 = outputs.reshape(rows, 128)
    t2 = targets.reshape(rows, 128)
    w_row = jnp.tile(base_weights, 128 // P).reshape(1, 128)

    # --- tiling ---------------------------------------------------------------
    itemsize = jnp.dtype(outputs.dtype).itemsize
    target_rows = max(8, (tile_bytes // (itemsize * 128)) // 8 * 8)
    block_rows = min(target_rows, ((rows + 7) // 8) * 8)
    total_blocks = pl.cdiv(rows, block_rows)
    n_split = max(1, min(int(n_split), total_blocks))
    steps = pl.cdiv(total_blocks, n_split)
    needs_mask = (n_split * steps * block_rows) != rows

    def in_idx(c, i):
        # Clamp so duplicated / overhanging visits never request a block whose
        # start is past the array; the in-kernel mask zeroes their contribution.
        return (jnp.minimum(c * steps + i, total_blocks - 1), 0)

    kernel = functools.partial(
        _weighted_loss_kernel,
        block_rows=block_rows, steps=steps, rows=rows, needs_mask=needs_mask)

    partials = pl.pallas_call(
        kernel,
        out_shape=jax.ShapeDtypeStruct((n_split, 8, 128), jnp.float32),
        grid_spec=pltpu.PrefetchScalarGridSpec(
            num_scalar_prefetch=0,
            grid=(n_split, steps),
            in_specs=[
                pl.BlockSpec((block_rows, 128), in_idx),
                pl.BlockSpec((block_rows, 128), in_idx),
                pl.BlockSpec((1, 128), lambda c, i: (0, 0)),   # resident weights
            ],
            out_specs=pl.BlockSpec((None, 8, 128), lambda c, i: (c, 0, 0)),
        ),
        compiler_params=pltpu.CompilerParams(
            dimension_semantics=("parallel", "arbitrary")),
    )(o2, t2, w_row)

    # Final tiny (<= n_split * 4 KiB) reduction in the wrapper.
    return jnp.sum(partials)


def make_base_weights(pre_min, pre_max, pre_interval):
    # Matches: [1 / factor for factor in range(pre_min, pre_max + pre_interval, pre_interval)]
    factors = list(range(pre_min, pre_max + pre_interval, pre_interval))
    return jnp.asarray([1.0 / f for f in factors], dtype=jnp.float32)


def _reference(outputs, targets, base_weights):
    o = jnp.asarray(outputs, jnp.float32)
    t = jnp.asarray(targets, jnp.float32)
    return jnp.sum(jnp.abs(o - t) * jnp.asarray(base_weights, jnp.float32)[None, :])


if __name__ == "__main__":
    base_w = make_base_weights(1, 8, 1)            # (P,) = (8,), matches the module
    P = int(base_w.shape[0])

    key = jax.random.PRNGKey(0)
    ks = jax.random.split(key, 8)

    # 1) Module-sized case (B=2): dispatcher uses the fused-XLA path.
    o_s = jax.random.normal(ks[0], (2, P), dtype=jnp.float32)
    t_s = jax.random.normal(ks[1], (2, P), dtype=jnp.float32)
    loss_s = weighted_loss(o_s, t_s, base_w)
    jax.block_until_ready(loss_s)
    assert jnp.allclose(loss_s, _reference(o_s, t_s, base_w), rtol=1e-5, atol=1e-5)

    # 2) Small aligned batch forced through the Pallas kernel
    #    (B*P = 2048 -> (16, 128) view, single grid step, no masking).
    o_a = jax.random.normal(ks[2], (256, P), dtype=jnp.float32)
    t_a = jax.random.normal(ks[3], (256, P), dtype=jnp.float32)
    loss_a = weighted_loss(o_a, t_a, base_w, force_pallas=True)
    jax.block_until_ready(loss_a)
    assert jnp.allclose(loss_a, _reference(o_a, t_a, base_w), rtol=1e-5, atol=1e-4)

    # 3) Ragged rows + multi-step grid: rows=187 with a 64 KiB tile
    #    (block_rows=128) -> 2 steps, last block partially masked in-kernel.
    o_r = jax.random.normal(ks[4], (2992, P), dtype=jnp.float32)
    t_r = jax.random.normal(ks[5], (2992, P), dtype=jnp.float32)
    loss_r = weighted_loss(o_r, t_r, base_w, force_pallas=True, tile_bytes=64 * 1024)
    jax.block_until_ready(loss_r)
    assert jnp.allclose(loss_r, _reference(o_r, t_r, base_w), rtol=1e-5, atol=1e-3)

    # 4) Large enough that the dispatcher picks the Pallas path on its own
    #    (default ~2 MiB input tiles).
    o_l = jax.random.normal(ks[6], (65536, P), dtype=jnp.float32)
    t_l = jax.random.normal(ks[7], (65536, P), dtype=jnp.float32)
    loss_l = weighted_loss(o_l, t_l, base_w)
    jax.block_until_ready(loss_l)
    assert jnp.allclose(loss_l, _reference(o_l, t_l, base_w), rtol=1e-4, atol=1e-2)

    print("KERNEL_OK")
</pallas_src>

<mosaic_0001>
module attributes {stable_mosaic.version = 11 : i64} {
  func.func @_weighted_loss_kernel(%arg0: i32, %arg1: i32, %arg2: memref<16x128xf32, #tpu.memory_space<vmem>>, %arg3: memref<16x128xf32, #tpu.memory_space<vmem>>, %arg4: memref<1x128xf32, #tpu.memory_space<vmem>>, %arg5: memref<1x8x128xf32, #tpu.memory_space<vmem>>) attributes {dimension_semantics = [#tpu.dimension_semantics<parallel>, #tpu.dimension_semantics<arbitrary>], iteration_bounds = array<i64: 1, 1>, scalar_prefetch = 0 : i64, scratch_operands = 0 : i64, tpu.core_type = #tpu.core_type<tc>, window_params = [{transform_indices = @transform_0, window_bounds = array<i64: 16, 128>}, {transform_indices = @transform_1, window_bounds = array<i64: 16, 128>}, {pipeline_mode = #tpu.pipeline_mode<synchronous>, transform_indices = @transform_2, window_bounds = array<i64: 1, 128>}, {transform_indices = @transform_3, window_bounds = array<i64: 1, 8, 128>}]} {
    %c0_i32 = arith.constant 0 : i32
    %0 = arith.cmpi eq, %arg1, %c0_i32 : i32
    %1 = arith.extui %0 : i1 to i32
    %c0_i32_0 = arith.constant 0 : i32
    %2 = arith.cmpi ne, %1, %c0_i32_0 : i32
    scf.if %2 {
      %cst_12 = arith.constant 0.000000e+00 : f32
      %18 = vector.broadcast %cst_12 : f32 to vector<8x128xf32>
      %c0_13 = arith.constant 0 : index
      %c0_14 = arith.constant 0 : index
      %c0_15 = arith.constant 0 : index
      %19 = vector.load %arg5[%c0_13, %c0_14, %c0_15] : memref<1x8x128xf32, #tpu.memory_space<vmem>>, vector<1x8x128xf32>
      %20 = vector.shape_cast %19 : vector<1x8x128xf32> to vector<8x128xf32>
      %21 = vector.shape_cast %18 : vector<8x128xf32> to vector<1x8x128xf32>
      tpu.vector_store %arg5[%c0_13, %c0_14, %c0_15], %21 {strides = array<i32>} : memref<1x8x128xf32, #tpu.memory_space<vmem>>, vector<1x8x128xf32>,
    } else {
    }
    %c0 = arith.constant 0 : index
    %c0_1 = arith.constant 0 : index
    %3 = vector.load %arg2[%c0, %c0_1] : memref<16x128xf32, #tpu.memory_space<vmem>>, vector<16x128xf32>
    %c0_2 = arith.constant 0 : index
    %c0_3 = arith.constant 0 : index
    %4 = vector.load %arg3[%c0_2, %c0_3] : memref<16x128xf32, #tpu.memory_space<vmem>>, vector<16x128xf32>
    %5 = arith.subf %3, %4 : vector<16x128xf32>
    %6 = math.absf %5 : vector<16x128xf32>
    %c0_4 = arith.constant 0 : index
    %c0_5 = arith.constant 0 : index
    %7 = vector.load %arg4[%c0_4, %c0_5] : memref<1x128xf32, #tpu.memory_space<vmem>>, vector<1x128xf32>
    %8 = vector.broadcast %7 : vector<1x128xf32> to vector<16x128xf32>
    %9 = arith.mulf %6, %8 : vector<16x128xf32>
    %c0_6 = arith.constant 0 : index
    %c0_7 = arith.constant 0 : index
    %c0_8 = arith.constant 0 : index
    %10 = vector.load %arg5[%c0_6, %c0_7, %c0_8] : memref<1x8x128xf32, #tpu.memory_space<vmem>>, vector<1x8x128xf32>
    %11 = vector.shape_cast %10 : vector<1x8x128xf32> to vector<8x128xf32>
    %12 = vector.shape_cast %9 : vector<16x128xf32> to vector<2x8x128xf32>
    %cst = arith.constant dense<0.000000e+00> : vector<8x128xf32>
    %13 = vector.multi_reduction <add>, %12, %cst [0] : vector<2x8x128xf32> to vector<8x128xf32>
    %14 = arith.addf %11, %13 : vector<8x128xf32>
    %c0_9 = arith.constant 0 : index
    %c0_10 = arith.constant 0 : index
    %c0_11 = arith.constant 0 : index
    %15 = vector.load %arg5[%c0_9, %c0_10, %c0_11] : memref<1x8x128xf32, #tpu.memory_space<vmem>>, vector<1x8x128xf32>
    %16 = vector.shape_cast %15 : vector<1x8x128xf32> to vector<8x128xf32>
    %17 = vector.shape_cast %14 : vector<8x128xf32> to vector<1x8x128xf32>
    tpu.vector_store %arg5[%c0_9, %c0_10, %c0_11], %17 {strides = array<i32>} : memref<1x8x128xf32, #tpu.memory_space<vmem>>, vector<1x8x128xf32>,
    return
  }
  func.func @transform_0(%arg0: i32, %arg1: i32) -> (i32, i32) {
    %c1_i32 = arith.constant 1 : i32
    %0 = arith.muli %arg0, %c1_i32 : i32
    %1 = arith.addi %0, %arg1 : i32
    %c0_i32 = arith.constant 0 : i32
    %2 = arith.minsi %1, %c0_i32 : i32
    %c0_i32_0 = arith.constant 0 : i32
    %c0_i32_1 = arith.constant 0 : i32
    return %2, %c0_i32_0 : i32, i32
  }
  func.func @transform_1(%arg0: i32, %arg1: i32) -> (i32, i32) {
    %c1_i32 = arith.constant 1 : i32
    %0 = arith.muli %arg0, %c1_i32 : i32
    %1 = arith.addi %0, %arg1 : i32
    %c0_i32 = arith.constant 0 : i32
    %2 = arith.minsi %1, %c0_i32 : i32
    %c0_i32_0 = arith.constant 0 : i32
    %c0_i32_1 = arith.constant 0 : i32
    return %2, %c0_i32_0 : i32, i32
  }
  func.func @transform_2(%arg0: i32, %arg1: i32) -> (i32, i32) {
    %c0_i32 = arith.constant 0 : i32
    %c0_i32_0 = arith.constant 0 : i32
    %c0_i32_1 = arith.constant 0 : i32
    return %c0_i32, %c0_i32_0 : i32, i32
  }
  func.func @transform_3(%arg0: i32, %arg1: i32) -> (i32, i32, i32) {
    %c0_i32 = arith.constant 0 : i32
    %c0_i32_0 = arith.constant 0 : i32
    %c0_i32_1 = arith.constant 0 : i32
    return %arg0, %c0_i32, %c0_i32_0 : i32, i32, i32
  }
}

</mosaic_0001>

<bundles_post_ra>
// kernel: tpu_custom_call.1
= control target key start
LH: loop header
LB: loop body
LE: loop exit
PB: predicated region body
PF: predicated region fallthrough
CT: control target
= control target key end

     0   :  { %8 = vsyncpa [#allocation3], 0  ;;  %s252_s0 = inlined_call_operand.hbm [shape: f32[16,128], index: 0, kind: input, shape index: {}]   ;;  %s253_s1 = inlined_call_operand.hbm [shape: f32[16,128], index: 1, kind: input, shape index: {}]   ;;  %s254_s2 = inlined_call_operand.vmem [shape: f32[1,128], index: 2, kind: input, shape index: {}]   ;;  %s255_s3 = inlined_call_operand.hbm [shape: f32[1,8,128], index: 3, kind: output, shape index: {}]  }
   0x1   :  { %9 = vsyncpa [#allocation6], 0 }
   0x2   :  { %10 = vsyncpa [#allocation4], 0  ;;  %s188_s12 = smov [#allocation2]   ;;  %s116_s16 = scalar_lea.hbm %s252_s0, 256 }
   0x3   :  { %s22_s13 = sshll.u32 %s188_s12, 4  ;;  %p117_p0 = scmp.ne.s32.totalorder %s252_s0, %s116_s16  ;;  %s23_s13 = int_to_ptr.vmem [resolvable:$true] %s22_s13 }
   0x4   :  { %p120_p1 = scmp.lt.u32.totalorder %s116_s16, %s252_s0 }
   0x6   :  { %p122_p2 = pnand %p120_p1, %p117_p0 }
   0x8   :  { %125 = shalt.err (!%p122_p2)
}
   0x9   :  { %s126_s21 = scalar_lea.vmem %s23_s13, 256  ;;  %p131_p4 = scmp.lt.s32.totalorder %s23_s13, %s23_s13 }
   0xa   :  { %p127_p3 = scmp.ne.s32.totalorder %s23_s13, %s126_s21  ;;  %p132_p5 = scmp.lt.s32.totalorder %s126_s21, %s126_s21 }
   0xc   :  { %p133_p6 = por %p132_p5, %p131_p4 }
   0xe   :  { %p134_p7 = pnand %p133_p6, %p127_p3 }
  0x10   :  { %137 = shalt.err (!%p134_p7)
}
  0x11   :  { %s189_s22 = smov 128   ;;  %s190_s23 = smov 8  }
  0x12   :  { %28 = dma.hbm_to_vmem [thread:$0]  %s252_s0, 256, %s23_s13, [#allocation3], %s189_s22, %s189_s22, %s190_s23  }
  0x13   :  { %s191_s26 = smov [#allocation5]   ;;  %s138_s30 = scalar_lea.hbm %s253_s1, 256 }
  0x14   :  { %s40_s27 = sshll.u32 %s191_s26, 4  ;;  %p139_p8 = scmp.ne.s32.totalorder %s253_s1, %s138_s30  ;;  %s41_s27 = int_to_ptr.vmem [resolvable:$true] %s40_s27 }
  0x15   :  { %p142_p9 = scmp.lt.u32.totalorder %s138_s30, %s253_s1 }
  0x17   :  { %p144_p10 = pnand %p142_p9, %p139_p8 }
  0x19   :  { %147 = shalt.err (!%p144_p10)
}
  0x1a   :  { %s148_s8 = scalar_lea.vmem %s41_s27, 256  ;;  %p153_p12 = scmp.lt.s32.totalorder %s41_s27, %s41_s27 }
  0x1b   :  { %p149_p11 = scmp.ne.s32.totalorder %s41_s27, %s148_s8  ;;  %p154_p13 = scmp.lt.s32.totalorder %s148_s8, %s148_s8 }
  0x1d   :  { %p155_p0 = por %p154_p13, %p153_p12 }
  0x1f   :  { %p156_p1 = pnand %p155_p0, %p149_p11 }
  0x21   :  { %159 = shalt.err (!%p156_p1)
}
  0x22   :  { %46 = dma.hbm_to_vmem [thread:$0]  %s253_s1, 256, %s41_s27, [#allocation6], %s189_s22, %s189_s22, %s190_s23  }
  0x23   :  { %182 = dma.done.wait [#allocation3], 256  }
  0x24   :  { %183 = vsyncadd [#allocation3], 4294967040 }
  0x25   :  { %184 = dma.done.wait [#allocation6], 256  }
  0x26   :  { %185 = vsyncadd [#allocation6], 4294967040  ;;  %v68_v0 = vld [vmem:[#allocation2] sm:$0xff]  ;;  %v69_v1 = vld [vmem:[#allocation2 + $0x8] sm:$0xff]  ;;  %s192_s12 = smov [#allocation7]  }
  0x27   :  { %v70_v2 = vld [vmem:[#allocation5] sm:$0xff]  ;;  %v71_v3 = vld [vmem:[#allocation5 + $0x8] sm:$0xff]  ;;  %v109_v6 = vld [vmem:[%s254_s2] ss:$0 sm:$0xff]  ;;  %s95_s1 = sshll.u32 %s192_s12, 4  ;;  %s96_s1 = int_to_ptr.vmem [resolvable:$true] %s95_s1 }
  0x28   :  { %v72_v4 = vsub.f32 %v68_v0, %v70_v2  ;;  %v73_v5 = vsub.f32 %v69_v1, %v71_v3  ;;  %s160_s13 = scalar_lea.vmem %s96_s1, 128  ;;  %p165_p3 = scmp.lt.s32.totalorder %s96_s1, %s96_s1 }
  0x29   :  { %p161_p2 = scmp.ne.s32.totalorder %s96_s1, %s160_s13  ;;  %p166_p4 = scmp.lt.s32.totalorder %s160_s13, %s160_s13 }
  0x2a   :  { %v74_v7 = vand.u32 2147483647, %v72_v4  ;;  %v75_v8 = vand.u32 2147483647, %v73_v5 }
  0x2b   :  { %p167_p5 = por %p166_p4, %p165_p3 }
  0x2c   :  { %v83_v9 = vmul.f32 %v109_v6, %v74_v7  ;;  %v84_v10 = vmul.f32 %v109_v6, %v75_v8 }
  0x2d   :  { %p168_p6 = pnand %p167_p5, %p161_p2 }
  0x2e   :  { %v86_v11 = vadd.f32 %v84_v10, %v83_v9 }
  0x30   :  { %88 = vst [vmem:[#allocation7] sm:$0xff] %v86_v11 }
  0x31   :  { %171 = shalt.err (!%p168_p6)
}
  0x32   :  { %s172_s2 = scalar_lea.hbm %s255_s3, 128 }
  0x33   :  { %p173_p7 = scmp.ne.s32.totalorder %s255_s3, %s172_s2  ;;  %p176_p8 = scmp.lt.u32.totalorder %s172_s2, %s255_s3 }
  0x35   :  { %p178_p9 = pnand %p176_p8, %p173_p7 }
  0x37   :  { %181 = shalt.err (!%p178_p9)
}
  0x38   :  { %98 = dma.vmem_to_hbm [thread:$0]  %s96_s1, 128, %s255_s3, [#allocation4]  }
  0x39   :  { %186 = dma.done.wait [#allocation4], 128  }
  0x3a   :  { %187 = vsyncadd [#allocation4], 4294967168 }
  0x3b   :  { %102 = vsyncpa [#allocation3], 1 }
  0x3c   :  { %103 = vsyncpa [#allocation6], 1 }
  0x3d   :  { %104 = vsyncpa [#allocation4], 1 }

</bundles_post_ra>
